<compile_context>
chip_gen: v7x
topology: tpu7x:2x2x1
jax: 0.10.0
libtpu: 0.0.40
codegen_flags: <defaults>
</compile_context>

<pallas_src>
import jax
import jax.numpy as jnp
from jax.experimental import pallas as pl
from jax.experimental.pallas import tpu as pltpu


def make_gradsolver_kernel(C, HID, n_step, lr_grad, scale, TP):
    """Returns the Pallas kernel body with static hyper-params baked in."""

    def kernel(y_ref, G_ref, c_ref, Wcat_ref, b1_ref, W2_ref, b2_ref,
               W_ref, b_ref, out_ref):
        y = y_ref[...]            # (C, TP)       observed input tile (state init)
        G = G_ref[...]            # (C, C)        scale * ((W-I)^T (W-I) + I)
        Wcat = Wcat_ref[...]      # (HID, HID+C)  [Wh | W1]
        W2 = W2_ref[...]          # (C, HID)

        # Hoisted out of the unrolled solver loop: bias broadcasts and the constant
        # part of the variational-cost gradient.
        const_g = jnp.broadcast_to(c_ref[...], (C, TP)) - scale * y   # c - scale*y
        b1_b = jnp.broadcast_to(b1_ref[...], (HID, TP))
        b2_b = jnp.broadcast_to(b2_ref[...], (C, TP))

        x = y                                        # init_state: nan_to_num(input)
        h = jnp.zeros((HID, TP), jnp.float32)        # grad_mod.reset_state(input)

        for step in range(n_step):                   # static unroll of solver loop
            # grad of (prior_cost + obs_cost) w.r.t. state (closed form, fused)
            g = jnp.dot(G, x, preferred_element_type=jnp.float32) + const_g
            # gmod = grad_mod(g): single fused recurrent matmul (K = HID + C)
            hg = jnp.concatenate([h, g], axis=0)     # h first -> sublane-aligned concat
            h = jnp.tanh(jnp.dot(Wcat, hg, preferred_element_type=jnp.float32) + b1_b)
            gm = jnp.dot(W2, h, preferred_element_type=jnp.float32) + b2_b
            # state_update = 1/(step+1) * gmod + lr*(step+1)/n_step * grad
            upd = (1.0 / (step + 1)) * gm + (lr_grad * (step + 1) / n_step) * g
            x = x - upd

        # eval mode: state = prior_cost.forward_ae(state)
        out_ref[...] = (jnp.dot(W_ref[...], x, preferred_element_type=jnp.float32)
                        + jnp.broadcast_to(b_ref[...], (C, TP)))

    return kernel


def grad_solver_forward(x_nchw, params, *, n_step=4, lr_grad=0.2, tile_hw=None):
    """Runs the GradSolver forward (eval mode) via a Pallas TPU kernel."""
    N, C, H, Wsp = x_nchw.shape
    HW = H * Wsp
    if tile_hw is None:
        tile_hw = HW                       # small problem: one lane-dense tile per image
    assert HW % tile_hw == 0, "H*W must tile by tile_hw"
    assert tile_hw == HW or tile_hw % 128 == 0, "tile_hw must be lane-aligned"
    M = N * C * HW                         # number of elements for the mean() costs
    scale = 2.0 / M

    # glue: NCHW -> (N, C, HW) is a free reshape (no transpose / HBM copy)
    y = jnp.nan_to_num(x_nchw).astype(jnp.float32).reshape(N, C, HW)

    # --- fold the prior-cost gradient algebraically (wrapper-side, tiny matrices) ---
    W = params["W"].astype(jnp.float32)
    I = jnp.eye(C, dtype=jnp.float32)
    Wm = W - I
    b = params["b"].reshape(C, 1).astype(jnp.float32)
    G = scale * (Wm.T @ Wm + I)            # grad = G @ x + c - scale*y
    c = scale * (Wm.T @ b)

    W1 = params["W1"].astype(jnp.float32)
    Wh = params["Wh"].astype(jnp.float32)
    Wcat = jnp.concatenate([Wh, W1], axis=1)        # (HID, HID + C)
    b1 = params["b1"].reshape(-1, 1).astype(jnp.float32)
    W2 = params["W2"].astype(jnp.float32)
    b2 = params["b2"].reshape(C, 1).astype(jnp.float32)
    HID = W1.shape[0]

    kernel = make_gradsolver_kernel(C, HID, n_step, lr_grad, scale, tile_hw)

    # weights/biases: constant index_map -> stay resident in VMEM across grid steps
    const = lambda shape: pl.BlockSpec(shape, lambda n, j: (0, 0))

    out = pl.pallas_call(
        kernel,
        out_shape=jax.ShapeDtypeStruct((N, C, HW), jnp.float32),
        grid_spec=pltpu.PrefetchScalarGridSpec(
            num_scalar_prefetch=0,
            grid=(N, HW // tile_hw),
            in_specs=[
                pl.BlockSpec((None, C, tile_hw), lambda n, j: (n, 0, j)),   # y tile
                const((C, C)),            # G
                const((C, 1)),            # c
                const((HID, HID + C)),    # Wcat = [Wh | W1]
                const((HID, 1)),          # b1
                const((C, HID)),          # W2
                const((C, 1)),            # b2
                const((C, C)),            # W   (final forward_ae)
                const((C, 1)),            # b
            ],
            out_specs=pl.BlockSpec((None, C, tile_hw), lambda n, j: (n, 0, j)),
        ),
        compiler_params=pltpu.CompilerParams(
            dimension_semantics=("parallel", "parallel")),
    )(y, G, c, Wcat, b1, W2, b2, W, b)

    # glue: (N, C, HW) -> NCHW is a free reshape
    return out.reshape(N, C, H, Wsp)


def grad_solver_reference(x_nchw, params, *, n_step=4, lr_grad=0.2):
    """Pure-JAX reference of the same forward (unfused formulation, for checking)."""
    N, C, H, Wsp = x_nchw.shape
    HW = H * Wsp
    M = N * C * HW
    scale = 2.0 / M
    y = jnp.nan_to_num(x_nchw).astype(jnp.float32).reshape(N, C, HW)
    W = params["W"]
    Wm = W - jnp.eye(C, dtype=jnp.float32)
    b = params["b"].reshape(C, 1)
    W1, Wh = params["W1"], params["Wh"]
    b1 = params["b1"].reshape(-1, 1)
    W2 = params["W2"]
    b2 = params["b2"].reshape(C, 1)
    HID = W1.shape[0]

    mm = lambda A, v: jnp.einsum("ij,njp->nip", A, v)
    x = y
    h = jnp.zeros((N, HID, HW), jnp.float32)
    for step in range(n_step):
        r = mm(Wm, x) + b
        g = scale * mm(Wm.T, r) + scale * (x - y)
        h = jnp.tanh(mm(W1, g) + mm(Wh, h) + b1)
        gm = mm(W2, h) + b2
        x = x - ((1.0 / (step + 1)) * gm + lr_grad * (step + 1) / n_step * g)
    out = mm(W, x) + b
    return out.reshape(N, C, H, Wsp)


def init_params(key, C, HID):
    ks = jax.random.split(key, 6)
    s = 0.1
    return {
        "W":  s * jax.random.normal(ks[0], (C, C),     jnp.float32),
        "b":  s * jax.random.normal(ks[1], (C,),       jnp.float32),
        "W1": s * jax.random.normal(ks[2], (HID, C),   jnp.float32),
        "Wh": s * jax.random.normal(ks[3], (HID, HID), jnp.float32),
        "b1": jnp.zeros((HID,), jnp.float32),
        "W2": s * jax.random.normal(ks[4], (C, HID),   jnp.float32),
        "b2": jnp.zeros((C,), jnp.float32),
    }


if __name__ == "__main__":
    key = jax.random.PRNGKey(0)
    k_x, k_p = jax.random.split(key)

    N, C, H, Wsp = 2, 4, 16, 16            # batch.input: (2, 4, 16, 16) NCHW
    HID = 32
    x = jax.random.normal(k_x, (N, C, H, Wsp), jnp.float32)
    params = init_params(k_p, C, HID)

    out = grad_solver_forward(x, params, n_step=4, lr_grad=0.2)
    out = jax.block_until_ready(out)

    ref = grad_solver_reference(x, params, n_step=4, lr_grad=0.2)
    assert out.shape == (N, C, H, Wsp)
    assert jnp.allclose(out, ref, atol=1e-5, rtol=1e-5), "mismatch vs JAX reference"

    # TODO(synk): torch.autograd.grad with create_graph=True only affects backprop
    # through the solver (training); forward values are reproduced exactly here.
    print("KERNEL_OK")
</pallas_src>

<mosaic_0001>
module attributes {stable_mosaic.version = 11 : i64} {
  func.func @kernel(%arg0: i32, %arg1: i32, %arg2: memref<1x4x256xf32, #tpu.memory_space<vmem>>, %arg3: memref<4x4xf32, #tpu.memory_space<vmem>>, %arg4: memref<4x1xf32, #tpu.memory_space<vmem>>, %arg5: memref<32x36xf32, #tpu.memory_space<vmem>>, %arg6: memref<32x1xf32, #tpu.memory_space<vmem>>, %arg7: memref<4x32xf32, #tpu.memory_space<vmem>>, %arg8: memref<4x1xf32, #tpu.memory_space<vmem>>, %arg9: memref<4x4xf32, #tpu.memory_space<vmem>>, %arg10: memref<4x1xf32, #tpu.memory_space<vmem>>, %arg11: memref<1x4x256xf32, #tpu.memory_space<vmem>>) attributes {dimension_semantics = [#tpu.dimension_semantics<parallel>, #tpu.dimension_semantics<parallel>], iteration_bounds = array<i64: 2, 1>, scalar_prefetch = 0 : i64, scratch_operands = 0 : i64, tpu.core_type = #tpu.core_type<tc>, window_params = [{transform_indices = @transform_0, window_bounds = array<i64: 1, 4, 256>}, {pipeline_mode = #tpu.pipeline_mode<synchronous>, transform_indices = @transform_1, window_bounds = array<i64: 4, 4>}, {pipeline_mode = #tpu.pipeline_mode<synchronous>, transform_indices = @transform_2, window_bounds = array<i64: 4, 1>}, {pipeline_mode = #tpu.pipeline_mode<synchronous>, transform_indices = @transform_3, window_bounds = array<i64: 32, 36>}, {pipeline_mode = #tpu.pipeline_mode<synchronous>, transform_indices = @transform_4, window_bounds = array<i64: 32, 1>}, {pipeline_mode = #tpu.pipeline_mode<synchronous>, transform_indices = @transform_5, window_bounds = array<i64: 4, 32>}, {pipeline_mode = #tpu.pipeline_mode<synchronous>, transform_indices = @transform_6, window_bounds = array<i64: 4, 1>}, {pipeline_mode = #tpu.pipeline_mode<synchronous>, transform_indices = @transform_7, window_bounds = array<i64: 4, 4>}, {pipeline_mode = #tpu.pipeline_mode<synchronous>, transform_indices = @transform_8, window_bounds = array<i64: 4, 1>}, {transform_indices = @transform_9, window_bounds = array<i64: 1, 4, 256>}]} {
    %c0 = arith.constant 0 : index
    %c0_0 = arith.constant 0 : index
    %c0_1 = arith.constant 0 : index
    %0 = vector.load %arg2[%c0, %c0_0, %c0_1] : memref<1x4x256xf32, #tpu.memory_space<vmem>>, vector<1x4x256xf32>
    %1 = vector.shape_cast %0 : vector<1x4x256xf32> to vector<4x256xf32>
    %c0_2 = arith.constant 0 : index
    %c0_3 = arith.constant 0 : index
    %2 = vector.load %arg3[%c0_2, %c0_3] : memref<4x4xf32, #tpu.memory_space<vmem>>, vector<4x4xf32>
    %c0_4 = arith.constant 0 : index
    %c0_5 = arith.constant 0 : index
    %3 = vector.load %arg5[%c0_4, %c0_5] : memref<32x36xf32, #tpu.memory_space<vmem>>, vector<32x36xf32>
    %c0_6 = arith.constant 0 : index
    %c0_7 = arith.constant 0 : index
    %4 = vector.load %arg7[%c0_6, %c0_7] : memref<4x32xf32, #tpu.memory_space<vmem>>, vector<4x32xf32>
    %c0_8 = arith.constant 0 : index
    %c0_9 = arith.constant 0 : index
    %5 = vector.load %arg4[%c0_8, %c0_9] : memref<4x1xf32, #tpu.memory_space<vmem>>, vector<4x1xf32>
    %6 = vector.shape_cast %5 : vector<4x1xf32> to vector<4x1xf32>
    %7 = vector.broadcast %6 : vector<4x1xf32> to vector<4x256xf32>
    %cst = arith.constant 9.765625E-4 : f32
    %8 = vector.broadcast %cst : f32 to vector<4x256xf32>
    %9 = arith.mulf %8, %1 : vector<4x256xf32>
    %10 = arith.subf %7, %9 : vector<4x256xf32>
    %c0_10 = arith.constant 0 : index
    %c0_11 = arith.constant 0 : index
    %11 = vector.load %arg6[%c0_10, %c0_11] : memref<32x1xf32, #tpu.memory_space<vmem>>, vector<32x1xf32>
    %12 = vector.shape_cast %11 : vector<32x1xf32> to vector<32x1xf32>
    %13 = vector.broadcast %12 : vector<32x1xf32> to vector<32x256xf32>
    %c0_12 = arith.constant 0 : index
    %c0_13 = arith.constant 0 : index
    %14 = vector.load %arg8[%c0_12, %c0_13] : memref<4x1xf32, #tpu.memory_space<vmem>>, vector<4x1xf32>
    %15 = vector.shape_cast %14 : vector<4x1xf32> to vector<4x1xf32>
    %16 = vector.broadcast %15 : vector<4x1xf32> to vector<4x256xf32>
    %cst_14 = arith.constant 0.000000e+00 : f32
    %17 = vector.broadcast %cst_14 : f32 to vector<32x256xf32>
    %cst_15 = arith.constant dense<0.000000e+00> : vector<4x256xf32>
    %18 = tpu.matmul %2, %1, %cst_15 {dimension_numbers = #tpu.dot_dimension_numbers<[1], [0], [0], [1], [0, 0, 1, 1], [], []>} : vector<4x4xf32>, vector<4x256xf32>, vector<4x256xf32> -> vector<4x256xf32>
    %19 = arith.addf %18, %10 : vector<4x256xf32>
    %20 = tpu.concatenate %17, %19 in 0 : vector<32x256xf32>, vector<4x256xf32> -> vector<36x256xf32>
    %cst_16 = arith.constant dense<0.000000e+00> : vector<32x256xf32>
    %21 = tpu.matmul %3, %20, %cst_16 {dimension_numbers = #tpu.dot_dimension_numbers<[1], [0], [0], [1], [0, 0, 1, 1], [], []>} : vector<32x36xf32>, vector<36x256xf32>, vector<32x256xf32> -> vector<32x256xf32>
    %22 = arith.addf %21, %13 : vector<32x256xf32>
    %23 = math.tanh %22 : vector<32x256xf32>
    %cst_17 = arith.constant dense<0.000000e+00> : vector<4x256xf32>
    %24 = tpu.matmul %4, %23, %cst_17 {dimension_numbers = #tpu.dot_dimension_numbers<[1], [0], [0], [1], [0, 0, 1, 1], [], []>} : vector<4x32xf32>, vector<32x256xf32>, vector<4x256xf32> -> vector<4x256xf32>
    %25 = arith.addf %24, %16 : vector<4x256xf32>
    %cst_18 = arith.constant 1.000000e+00 : f32
    %26 = vector.broadcast %cst_18 : f32 to vector<4x256xf32>
    %27 = arith.mulf %26, %25 : vector<4x256xf32>
    %cst_19 = arith.constant 5.000000e-02 : f32
    %28 = vector.broadcast %cst_19 : f32 to vector<4x256xf32>
    %29 = arith.mulf %28, %19 : vector<4x256xf32>
    %30 = arith.addf %27, %29 : vector<4x256xf32>
    %31 = arith.subf %1, %30 : vector<4x256xf32>
    %cst_20 = arith.constant dense<0.000000e+00> : vector<4x256xf32>
    %32 = tpu.matmul %2, %31, %cst_20 {dimension_numbers = #tpu.dot_dimension_numbers<[1], [0], [0], [1], [0, 0, 1, 1], [], []>} : vector<4x4xf32>, vector<4x256xf32>, vector<4x256xf32> -> vector<4x256xf32>
    %33 = arith.addf %32, %10 : vector<4x256xf32>
    %34 = tpu.concatenate %23, %33 in 0 : vector<32x256xf32>, vector<4x256xf32> -> vector<36x256xf32>
    %cst_21 = arith.constant dense<0.000000e+00> : vector<32x256xf32>
    %35 = tpu.matmul %3, %34, %cst_21 {dimension_numbers = #tpu.dot_dimension_numbers<[1], [0], [0], [1], [0, 0, 1, 1], [], []>} : vector<32x36xf32>, vector<36x256xf32>, vector<32x256xf32> -> vector<32x256xf32>
    %36 = arith.addf %35, %13 : vector<32x256xf32>
    %37 = math.tanh %36 : vector<32x256xf32>
    %cst_22 = arith.constant dense<0.000000e+00> : vector<4x256xf32>
    %38 = tpu.matmul %4, %37, %cst_22 {dimension_numbers = #tpu.dot_dimension_numbers<[1], [0], [0], [1], [0, 0, 1, 1], [], []>} : vector<4x32xf32>, vector<32x256xf32>, vector<4x256xf32> -> vector<4x256xf32>
    %39 = arith.addf %38, %16 : vector<4x256xf32>
    %cst_23 = arith.constant 5.000000e-01 : f32
    %40 = vector.broadcast %cst_23 : f32 to vector<4x256xf32>
    %41 = arith.mulf %40, %39 : vector<4x256xf32>
    %cst_24 = arith.constant 1.000000e-01 : f32
    %42 = vector.broadcast %cst_24 : f32 to vector<4x256xf32>
    %43 = arith.mulf %42, %33 : vector<4x256xf32>
    %44 = arith.addf %41, %43 : vector<4x256xf32>
    %45 = arith.subf %31, %44 : vector<4x256xf32>
    %cst_25 = arith.constant dense<0.000000e+00> : vector<4x256xf32>
    %46 = tpu.matmul %2, %45, %cst_25 {dimension_numbers = #tpu.dot_dimension_numbers<[1], [0], [0], [1], [0, 0, 1, 1], [], []>} : vector<4x4xf32>, vector<4x256xf32>, vector<4x256xf32> -> vector<4x256xf32>
    %47 = arith.addf %46, %10 : vector<4x256xf32>
    %48 = tpu.concatenate %37, %47 in 0 : vector<32x256xf32>, vector<4x256xf32> -> vector<36x256xf32>
    %cst_26 = arith.constant dense<0.000000e+00> : vector<32x256xf32>
    %49 = tpu.matmul %3, %48, %cst_26 {dimension_numbers = #tpu.dot_dimension_numbers<[1], [0], [0], [1], [0, 0, 1, 1], [], []>} : vector<32x36xf32>, vector<36x256xf32>, vector<32x256xf32> -> vector<32x256xf32>
    %50 = arith.addf %49, %13 : vector<32x256xf32>
    %51 = math.tanh %50 : vector<32x256xf32>
    %cst_27 = arith.constant dense<0.000000e+00> : vector<4x256xf32>
    %52 = tpu.matmul %4, %51, %cst_27 {dimension_numbers = #tpu.dot_dimension_numbers<[1], [0], [0], [1], [0, 0, 1, 1], [], []>} : vector<4x32xf32>, vector<32x256xf32>, vector<4x256xf32> -> vector<4x256xf32>
    %53 = arith.addf %52, %16 : vector<4x256xf32>
    %cst_28 = arith.constant 0.333333343 : f32
    %54 = vector.broadcast %cst_28 : f32 to vector<4x256xf32>
    %55 = arith.mulf %54, %53 : vector<4x256xf32>
    %cst_29 = arith.constant 1.500000e-01 : f32
    %56 = vector.broadcast %cst_29 : f32 to vector<4x256xf32>
    %57 = arith.mulf %56, %47 : vector<4x256xf32>
    %58 = arith.addf %55, %57 : vector<4x256xf32>
    %59 = arith.subf %45, %58 : vector<4x256xf32>
    %cst_30 = arith.constant dense<0.000000e+00> : vector<4x256xf32>
    %60 = tpu.matmul %2, %59, %cst_30 {dimension_numbers = #tpu.dot_dimension_numbers<[1], [0], [0], [1], [0, 0, 1, 1], [], []>} : vector<4x4xf32>, vector<4x256xf32>, vector<4x256xf32> -> vector<4x256xf32>
    %61 = arith.addf %60, %10 : vector<4x256xf32>
    %62 = tpu.concatenate %51, %61 in 0 : vector<32x256xf32>, vector<4x256xf32> -> vector<36x256xf32>
    %cst_31 = arith.constant dense<0.000000e+00> : vector<32x256xf32>
    %63 = tpu.matmul %3, %62, %cst_31 {dimension_numbers = #tpu.dot_dimension_numbers<[1], [0], [0], [1], [0, 0, 1, 1], [], []>} : vector<32x36xf32>, vector<36x256xf32>, vector<32x256xf32> -> vector<32x256xf32>
    %64 = arith.addf %63, %13 : vector<32x256xf32>
    %65 = math.tanh %64 : vector<32x256xf32>
    %cst_32 = arith.constant dense<0.000000e+00> : vector<4x256xf32>
    %66 = tpu.matmul %4, %65, %cst_32 {dimension_numbers = #tpu.dot_dimension_numbers<[1], [0], [0], [1], [0, 0, 1, 1], [], []>} : vector<4x32xf32>, vector<32x256xf32>, vector<4x256xf32> -> vector<4x256xf32>
    %67 = arith.addf %66, %16 : vector<4x256xf32>
    %cst_33 = arith.constant 2.500000e-01 : f32
    %68 = vector.broadcast %cst_33 : f32 to vector<4x256xf32>
    %69 = arith.mulf %68, %67 : vector<4x256xf32>
    %cst_34 = arith.constant 2.000000e-01 : f32
    %70 = vector.broadcast %cst_34 : f32 to vector<4x256xf32>
    %71 = arith.mulf %70, %61 : vector<4x256xf32>
    %72 = arith.addf %69, %71 : vector<4x256xf32>
    %73 = arith.subf %59, %72 : vector<4x256xf32>
    %c0_35 = arith.constant 0 : index
    %c0_36 = arith.constant 0 : index
    %74 = vector.load %arg9[%c0_35, %c0_36] : memref<4x4xf32, #tpu.memory_space<vmem>>, vector<4x4xf32>
    %cst_37 = arith.constant dense<0.000000e+00> : vector<4x256xf32>
    %75 = tpu.matmul %74, %73, %cst_37 {dimension_numbers = #tpu.dot_dimension_numbers<[1], [0], [0], [1], [0, 0, 1, 1], [], []>} : vector<4x4xf32>, vector<4x256xf32>, vector<4x256xf32> -> vector<4x256xf32>
    %c0_38 = arith.constant 0 : index
    %c0_39 = arith.constant 0 : index
    %76 = vector.load %arg10[%c0_38, %c0_39] : memref<4x1xf32, #tpu.memory_space<vmem>>, vector<4x1xf32>
    %77 = vector.shape_cast %76 : vector<4x1xf32> to vector<4x1xf32>
    %78 = vector.broadcast %77 : vector<4x1xf32> to vector<4x256xf32>
    %79 = arith.addf %75, %78 : vector<4x256xf32>
    %c0_40 = arith.constant 0 : index
    %c0_41 = arith.constant 0 : index
    %c0_42 = arith.constant 0 : index
    %80 = vector.load %arg11[%c0_40, %c0_41, %c0_42] : memref<1x4x256xf32, #tpu.memory_space<vmem>>, vector<1x4x256xf32>
    %81 = vector.shape_cast %80 : vector<1x4x256xf32> to vector<4x256xf32>
    %82 = vector.shape_cast %79 : vector<4x256xf32> to vector<1x4x256xf32>
    tpu.vector_store %arg11[%c0_40, %c0_41, %c0_42], %82 {strides = array<i32>} : memref<1x4x256xf32, #tpu.memory_space<vmem>>, vector<1x4x256xf32>,
    return
  }
  func.func @transform_0(%arg0: i32, %arg1: i32) -> (i32, i32, i32) {
    %c0_i32 = arith.constant 0 : i32
    %c0_i32_0 = arith.constant 0 : i32
    return %arg0, %c0_i32, %arg1 : i32, i32, i32
  }
  func.func @transform_1(%arg0: i32, %arg1: i32) -> (i32, i32) {
    %c0_i32 = arith.constant 0 : i32
    %c0_i32_0 = arith.constant 0 : i32
    %c0_i32_1 = arith.constant 0 : i32
    return %c0_i32, %c0_i32_0 : i32, i32
  }
  func.func @transform_2(%arg0: i32, %arg1: i32) -> (i32, i32) {
    %c0_i32 = arith.constant 0 : i32
    %c0_i32_0 = arith.constant 0 : i32
    %c0_i32_1 = arith.constant 0 : i32
    return %c0_i32, %c0_i32_0 : i32, i32
  }
  func.func @transform_3(%arg0: i32, %arg1: i32) -> (i32, i32) {
    %c0_i32 = arith.constant 0 : i32
    %c0_i32_0 = arith.constant 0 : i32
    %c0_i32_1 = arith.constant 0 : i32
    return %c0_i32, %c0_i32_0 : i32, i32
  }
  func.func @transform_4(%arg0: i32, %arg1: i32) -> (i32, i32) {
    %c0_i32 = arith.constant 0 : i32
    %c0_i32_0 = arith.constant 0 : i32
    %c0_i32_1 = arith.constant 0 : i32
    return %c0_i32, %c0_i32_0 : i32, i32
  }
  func.func @transform_5(%arg0: i32, %arg1: i32) -> (i32, i32) {
    %c0_i32 = arith.constant 0 : i32
    %c0_i32_0 = arith.constant 0 : i32
    %c0_i32_1 = arith.constant 0 : i32
    return %c0_i32, %c0_i32_0 : i32, i32
  }
  func.func @transform_6(%arg0: i32, %arg1: i32) -> (i32, i32) {
    %c0_i32 = arith.constant 0 : i32
    %c0_i32_0 = arith.constant 0 : i32
    %c0_i32_1 = arith.constant 0 : i32
    return %c0_i32, %c0_i32_0 : i32, i32
  }
  func.func @transform_7(%arg0: i32, %arg1: i32) -> (i32, i32) {
    %c0_i32 = arith.constant 0 : i32
    %c0_i32_0 = arith.constant 0 : i32
    %c0_i32_1 = arith.constant 0 : i32
    return %c0_i32, %c0_i32_0 : i32, i32
  }
  func.func @transform_8(%arg0: i32, %arg1: i32) -> (i32, i32) {
    %c0_i32 = arith.constant 0 : i32
    %c0_i32_0 = arith.constant 0 : i32
    %c0_i32_1 = arith.constant 0 : i32
    return %c0_i32, %c0_i32_0 : i32, i32
  }
  func.func @transform_9(%arg0: i32, %arg1: i32) -> (i32, i32, i32) {
    %c0_i32 = arith.constant 0 : i32
    %c0_i32_0 = arith.constant 0 : i32
    return %arg0, %c0_i32, %arg1 : i32, i32, i32
  }
}

</mosaic_0001>

<bundles_post_ra>
// kernel: tpu_custom_call.1
= control target key start
LH: loop header
LB: loop body
LE: loop exit
PB: predicated region body
PF: predicated region fallthrough
CT: control target
= control target key end

     0   :  { %14 = vsyncpa [#allocation3], 0  ;;  %s2398_s0 = inlined_call_operand.vmem [shape: f32[2,4,256], index: 0, kind: input, shape index: {}]   ;;  %s2399_s1 = inlined_call_operand.vmem [shape: f32[4,4], index: 1, kind: input, shape index: {}]   ;;  %s2400_s2 = inlined_call_operand.vmem [shape: f32[4,1], index: 2, kind: input, shape index: {}]   ;;  %s2401_s3 = inlined_call_operand.vmem [shape: f32[32,36], index: 3, kind: input, shape index: {}]   ;;  %s2402_s4 = inlined_call_operand.vmem [shape: f32[32,1], index: 4, kind: input, shape index: {}]   ;;  %s2403_s5 = inlined_call_operand.vmem [shape: f32[4,32], index: 5, kind: input, shape index: {}]   ;;  %s2404_s6 = inlined_call_operand.vmem [shape: f32[4,1], index: 6, kind: input, shape index: {}]   ;;  %s2405_s7 = inlined_call_operand.vmem [shape: f32[4,4], index: 7, kind: input, shape index: {}]   ;;  %s2406_s8 = inlined_call_operand.vmem [shape: f32[4,1], index: 8, kind: input, shape index: {}]   ;;  %s2407_s9 = inlined_call_operand.hbm [shape: f32[2,4,256], index: 9, kind: output, shape index: {}]  }
   0x1   :  { %16 = vsyncpa [#allocation3 + $0x1], 0  ;;  %s2041_s30 = smov 0   ;;  %s2043_s10 = smov 0  }
   0x2   :  { %s2045_s11 = smov 0   ;;  %s2047_s12 = smov 0  }
   0x3   :  { %s2049_s13 = smov 0   ;;  %s2051_s14 = smov 0  }
   0x4 LB: > { %s1664_s15 = sadd.s32 4294967295, %s1985_s14   ;;  %s1665_s16 = sadd.s32 4294967294, %s1985_s14   ;;  %s1985_s14 = sphi %s2051_s14, %s22_s14   ;;  %s1981_s13 = sphi %s2049_s13, %s2414_s13   ;;  %s1977_s12 = sphi %s2047_s12, %s2413_s12   ;;  %s1973_s11 = sphi %s2045_s11, %s2412_s11   ;;  %s1969_s10 = sphi %s2043_s10, %s2411_s10   ;;  %s1965_s30 = sphi %s2041_s30, %s2410_s30  }
   0x5   : > { %s34_s17 = sadd.s32 1, %s1981_s13  ;;  %s239_s18 = sadd.s32 1, %s1973_s11 }
   0x6   : > { %p36_p0 = scmp.ge.s32.totalorder %s34_s17, 2  ;;  %p249_p1 = scmp.ne.s32.totalorder %s1973_s11, %s1969_s10 }
   0x7   : > { %p250_p2 = scmp.eq.s32.totalorder %s1664_s15, 1  ;;  %p255_p3 = scmp.ne.s32.totalorder %s1969_s10, %s1965_s30 }
   0x8   : > { %s2416_s17 = smov (%p36_p0, %s34_s17), 0  ;;  %p256_p5 = scmp.eq.s32.totalorder %s1665_s16, 1 }
   0x9   : > { %p2081_p4 = por %p250_p2, %p249_p1  ;;  %s234_s20 = ssub.s32 %s1981_s13, %s2416_s17 }
   0xa   : > { %p1668_p6 = scmp.ge.s32.totalorder %s1985_s14, 1  ;;  %p237_p7 = scmp.eq.s32.totalorder %s234_s20, 0 }
   0xb   : > { %p2088_p8 = por %p256_p5, %p255_p3  ;;  %p311_p9 = scmp.lt.s32.totalorder %s1985_s14, 3 }
   0xc   : > { %s2094_s22 = scalar_select %p237_p7, %s1973_s11, %s239_s18  }
   0xd   : > { %p312_p10 = pnand %p1668_p6, %p311_p9 }
   0xe   : > { %p352_p11 = scmp.lt.s32.totalorder (!%p312_p10), %s1977_s12, 1  ;;  %v1987_v0 = vmov (!%p312_p10), 0.0   ;;  %v369_v1 = vld [vmem:[%s2400_s2] sm:$0xf] (!%p312_p10)  ;;  %v1988_v2 = vmov (!%p312_p10), 0   ;;  %vm417_vm0 = vcmask (!%p312_p10), 1043456  }
   0xf   : > { %315 = sbr.rel (%p312_p10) target bundleno = 3012 (0xbc4), region = 56  ;;  %486 = vmatprep.mubr.f32.mxu0 (!%p312_p10), %v1987_v0  ;;  %576 = vmatprep.mubr.f32.mxu1 (!%p312_p10), %v1987_v0  ;;  %v381_v3 = vld [vmem:[%s2402_s4] sm:$0xff] (!%p312_p10)  ;;  %vm413_vm1 = vcmask (!%p312_p10), 31744   ;;  %v384_v7 = vld [vmem:[%s2402_s4 + $0x18] sm:$0xff] (!%p312_p10)  ;;  %v1989_v9 = vmov (!%p312_p10), 0.0|0.0   ;;  %v382_v10 = vld [vmem:[%s2402_s4 + $0x8] sm:$0xff] (!%p312_p10) }
  0x10   : > { %1840 = vset.pattern.permute.xlu0 (!%p312_p10), %v1988_v2  ;;  %1841 = vset.pattern.permute.xlu1 (!%p312_p10), %v1988_v2  ;;  %v2116_v6 = vld [vmem:[%s2399_s1] sm:$0xf] (!%p312_p10)  ;;  %v383_v11 = vld [vmem:[%s2402_s4 + $0x10] sm:$0xff] (!%p312_p10)  ;;  %vm493_vm2 = vcmask (!%p312_p10), 293888   ;;  %v2165_v23 = vld [vmem:[%s2401_s3 + $0x8] sm:$0xff] (!%p312_p10)  ;;  %vm609_vm3 = vcmask (!%p312_p10), 261120  }
  0x11   : > { %372 = vperm.xlu0 (!%p312_p10), %1840, %v369_v1   ;;  %v1480_v8 = vld [vmem:[%s2406_s8] sm:$0xf] (!%p312_p10)  ;;  %1722 = vmatprep.subr.bf16.mxu1 (!%p312_p10), %v1989_v9  ;;  %v2173_v24 = vld [vmem:[%s2401_s3 + $0x10] sm:$0xff] (!%p312_p10)  ;;  %v2181_v25 = vld [vmem:[%s2401_s3 + $0x18] sm:$0xff] (!%p312_p10)  ;;  %s348_s23 = sand.u32 (!%p312_p10), 1, %s1969_s10  }
  0x12   : > { %1723 = vmatpush1.bf16.msra.mxu1 (!%p312_p10), %v1989_v9  ;;  %392 = vperm.xlu1 (!%p312_p10), %1841, %v382_v10   ;;  %v405_v12 = vld [vmem:[%s2404_s6] sm:$0xf] (!%p312_p10)  ;;  %s1669_s24 = sshll.u32 (!%p312_p10), %s348_s23, 3 }
  0x13   : > { %1724 = vmatprep.subr.bf16.mxu1 (!%p312_p10), %v1989_v9  ;;  %v2153_v22 = vld [vmem:[%s2401_s3] sm:$0xff] (!%p312_p10) }
  0x14   : > { %v2205_v58 = vld [vmem:[%s2403_s5] sm:$0xf] (!%p312_p10) }
  0x15   : > { %387 = vperm.xlu0 (!%p312_p10), %1840, %v381_v3  }
  0x16   : > { %s353_s25 = scalar_select %p352_p11, %s1977_s12, 1  ;;  %1725 = vmatpush1.bf16.msra.mxu1 %v1989_v9  ;;  %397 = vperm.xlu1 %1841, %v383_v11  }
  0x18   : > { %s1720_s26 = sshll.u32 %s353_s25, 3  ;;  %s1721_s25 = sshll.u32 %s1977_s12, 7 }
  0x19   : > { %s359_s16 = scalar_lea.vmem %s2398_s0, %s1720_s26  ;;  %402 = vperm.xlu0 %1840, %v384_v7   ;;  %s350_s26 = scalar_lea.vmem [#allocation2], %s1669_s24 }
  0x1a   : > { %v2109_v4 = vld [vmem:[%s359_s16] sm:$0xff]  ;;  %408 = vperm.xlu1 %1841, %v405_v12   ;;  %s1588_s27 = sshll.u32 %s350_s26, 4  ;;  %s2351_s15 = scalar_lea.hbm %s2407_s9, %s1721_s25  ;;  %s2353_s27 = int_to_ptr.vmem [resolvable:$true] %s1588_s27 }
  0x1b   : > { %v412_v5 = vcombine.high %v2109_v4, %v2109_v4  ;;  %v375_v13 = vmul.f32 0.0009765625, %v2109_v4  ;;  %s1572_s16 = scalar_lea.sflag [#allocation3], %s348_s23  ;;  %s1907_s18 = scalar_lea.vmem %s2353_s27, 128 }
  0x1c   : > { %p1908_p12 = scmp.ne.s32.totalorder %s2353_s27, %s1907_s18  ;;  %s1990_s12 = smov [#allocation2]  }
  0x1d   : > { %1672 = vmatprep.subr.msk.mxu0 %vm417_vm0, %v412_v5  ;;  %1483 = vperm.xlu0 %1840, %v1480_v8   ;;  %v377_v14 = vcombine.high %v375_v13, %v375_v13  ;;  %s1911_s20 = sshll.u32 %s1990_s12, 4  ;;  %s1912_s20 = int_to_ptr.vmem [resolvable:$false] %s1911_s20 }
  0x1e   : > { %1673 = vmatpush1.msk.msra.mxu0 %vm417_vm0, %v2109_v4  ;;  %p1909_p13 = pnand %p1908_p12, %p2081_p4  ;;  %s1913_s24 = scalar_lea.vmem %s1912_s20, 256 }
  0x1f   : > { %1674 = vmatmul.mubr.msk.f32.vlgmr.msra.gmra.mrb[0].mxu0 %vm413_vm1, %v2116_v6  ;;  %p1914_p1 = scmp.lt.s32.totalorder %s2353_s27, %s1912_s20  ;;  %p1915_p2 = scmp.lt.s32.totalorder %s1913_s24, %s1907_s18 }
  0x20   : > { %677 = vmatprep.mubr.f32.mxu0 %v1987_v0  ;;  %p1910_p0 = pneg %p1909_p13 }
  0x21   : > { %p1916_p3 = por %p1915_p2, %p1914_p1 }
  0x23   : > { %p1917_p5 = pnand %p1916_p3, %p1910_p0 }
  0x90   : > { %v373_v15 = vpop.permute.xlu0 %372 }
  0x91   : > { %v2140_v16 = vsub.f32 %v373_v15, %v377_v14  ;;  %v2142_v17 = vsub.f32 %v373_v15, %v375_v13  ;;  %v2189_v30 = vpop.permute.xlu1 %392 }
  0x94   : > { %v2186_v26 = vpop.permute.xlu0 %387 }
  0x95   : > { %v2194_v36 = vpop.permute.xlu1 %397 }
  0x98   : > { %v2198_v41 = vpop.permute.xlu0 %402 }
  0x99   : > { %v2210_v59 = vpop.permute.xlu1 %408 }
  0xf2   : > { %v488_v18 = vpop.f32.mrb[0].mxu0 }
  0xf3   : > { %v490_v19 = vpop.f32.mrb[1].mxu0  ;;  %v2148_v21 = vadd.f32 %v488_v18, %v2142_v17 }
  0xf4   : > { %v2145_v20 = vadd.f32 %v490_v19, %v2140_v16 }
  0xf5   : > { %v684_v61 = vmul.f32 0.05, %v2148_v21 }
  0xf6   : > { %1675 = vmatprep.subr.msk.mxu1 %vm417_vm0, %v2145_v20  ;;  %v685_v1 = vmul.f32 0.05, %v2145_v20 }
  0xf7   : > { %1676 = vmatpush1.msk.msra.mxu1 %vm417_vm0, %v2148_v21 }
  0xf8   : > { %1677 = vmatmul.mubr.msk.f32.vlgmr.msra.gmra.mrb[0].mxu1 %vm493_vm2, %v2153_v22 }
  0xf9   : > { %582 = vmatprep.mubr.f32.mxu1 %v1987_v0 }
  0xfc   : > { %1678 = vmatmul.mubr.msk.f32.gmra.mrb[2].mxu1 %vm493_vm2, %v2165_v23 }
  0xfd   : > { %588 = vmatprep.mubr.f32.mxu1 %v1987_v0 }
 0x100   : > { %1679 = vmatmul.mubr.msk.f32.gmra.mrb[4].mxu1 %vm493_vm2, %v2173_v24 }
 0x101   : > { %594 = vmatprep.mubr.f32.mxu1 %v1987_v0 }
 0x104   : > { %1680 = vmatmul.mubr.msk.f32.gmra.mrb[6].mxu1 %vm493_vm2, %v2181_v25 }
 0x105   : > { %937 = vmatprep.mubr.f32.mxu1 %v1987_v0 }
 0x1cb   : > { %v578_v27 = vpop.f32.mrb[0].mxu1 }
 0x1cc   : > { %v579_v28 = vadd.f32 %v578_v27, %v2186_v26  ;;  %v580_v29 = vpop.f32.mrb[1].mxu1 }
 0x1cd   : > { %v581_v31 = vadd.f32 %v580_v29, %v2186_v26 }
 0x1ce   : > { %1843 = vtanh.f32 %v579_v28 }
 0x1cf   : > { %v584_v32 = vpop.f32.mrb[2].mxu1  ;;  %1845 = vtanh.f32 %v581_v31 }
 0x1d0   : > { %v585_v33 = vadd.f32 %v584_v32, %v2189_v30  ;;  %v586_v34 = vpop.f32.mrb[3].mxu1 }
 0x1d1   : > { %v587_v35 = vadd.f32 %v586_v34, %v2189_v30 }
 0x1d2   : > { %1847 = vtanh.f32 %v585_v33 }
 0x1d3   : > { %1849 = vtanh.f32 %v587_v35  ;;  %v590_v37 = vpop.f32.mrb[4].mxu1 }
 0x1d4   : > { %v591_v38 = vadd.f32 %v590_v37, %v2194_v36  ;;  %v592_v39 = vpop.f32.mrb[5].mxu1 }
 0x1d5   : > { %v593_v40 = vadd.f32 %v592_v39, %v2194_v36 }
 0x1d6   : > { %1851 = vtanh.f32 %v591_v38 }
 0x1d7   : > { %v596_v42 = vpop.f32.mrb[6].mxu1  ;;  %1853 = vtanh.f32 %v593_v40 }
 0x1d8   : > { %v597_v43 = vadd.f32 %v596_v42, %v2198_v41  ;;  %v598_v44 = vpop.f32.mrb[7].mxu1  ;;  %v1844_v46 = vpop.eup %1843 }
 0x1d9   : > { %v599_v45 = vadd.f32 %v598_v44, %v2198_v41  ;;  %v1846_v47 = vpop.eup %1845 }
 0x1da   : > { %1855 = vtanh.f32 %v597_v43 }
 0x1db   : > { %1857 = vtanh.f32 %v599_v45 }
 0x1dc   : > { %v1848_v48 = vpop.eup %1847 }
 0x1dd   : > { %v1850_v49 = vpop.eup %1849  ;;  %v1728_v50 = vpack.c.bf16 %v1848_v48, %v1844_v46 }
 0x1de   : > { %v1726_v51 = vpack.c.bf16 %v1850_v49, %v1846_v47 }
 0x1e0   : > { %1727 = vmatprep.subr.bf16.mxu0 %v1726_v51  ;;  %v1852_v52 = vpop.eup %1851 }
 0x1e1   : > { %1729 = vmatpush1.bf16.msra.mxu0 %v1728_v50  ;;  %v1854_v53 = vpop.eup %1853 }
 0x1e4   : > { %v1856_v54 = vpop.eup %1855 }
 0x1e5   : > { %v1858_v55 = vpop.eup %1857  ;;  %v1732_v56 = vpack.c.bf16 %v1856_v54, %v1852_v52 }
 0x1e6   : > { %v1730_v57 = vpack.c.bf16 %v1858_v55, %v1854_v53 }
 0x1e8   : > { %1731 = vmatprep.subr.bf16.mxu0 %v1730_v57 }
 0x1e9   : > { %1733 = vmatpush1.bf16.msra.mxu0 %v1732_v56 }
 0x1ec   : > { %1681 = vmatmul.mubr.msk.f32.vlgmr.msra.gmra.mrb[2].mxu0 %vm609_vm3, %v2205_v58 }
 0x1ed   : > { %763 = vmatprep.mubr.f32.mxu0 %v1987_v0 }
 0x2bf   : > { %v679_v60 = vpop.f32.mrb[2].mxu0 }
 0x2c0   : > { %v680_v62 = vadd.f32 %v679_v60, %v2210_v59  ;;  %v681_v63 = vpop.f32.mrb[3].mxu0 }
 0x2c1   : > { %v682_v2 = vadd.f32 %v681_v63, %v2210_v59 }
 0x2c2   : > { %v686_v3 = vadd.f32 %v684_v61, %v680_v62 }
 0x2c3   : > { %v687_v5 = vadd.f32 %v685_v1, %v682_v2 }
 0x2c5   : > { %v690_v7 = vcombine.low %v686_v3, %v687_v5 }
 0x2c7   : > { %v2217_v8 = vsub.f32 %v2109_v4, %v690_v7 }
 0x2c9   : > { %v694_v9 = vcombine.high %v2217_v8, %v2217_v8 }
 0x2cb   : > { %1682 = vmatprep.subr.msk.mxu0 %vm417_vm0, %v694_v9 }
 0x2cc   : > { %1683 = vmatpush1.msk.msra.mxu0 %vm417_vm0, %v2217_v8 }
 0x2cd   : > { %1684 = vmatmul.mubr.msk.f32.vlgmr.msra.gmra.mrb[4].mxu0 %vm413_vm1, %v2116_v6  ;;  %1735 = vmatprep.subr.bf16.mxu0 %v1726_v51 }
 0x2ce   : > { %1737 = vmatpush1.bf16.msra.mxu0 %v1728_v50  ;;  %840 = vmatprep.mubr.f32.mxu0 %v1987_v0 }
 0x2cf   : > { %1739 = vmatprep.subr.bf16.mxu0 %v1730_v57 }
 0x2d2   : > { %1741 = vmatpush1.bf16.msra.mxu0 %v1732_v56 }
 0x3a0   : > { %v765_v10 = vpop.f32.mrb[4].mxu0 }
 0x3a1   : > { %v767_v4 = vpop.f32.mrb[5].mxu0  ;;  %v766_v12 = vadd.f32 %v765_v10, %v2142_v17 }
 0x3a2   : > { %v2228_v11 = vadd.f32 %v767_v4, %v2140_v16 }
 0x3a3   : > { %v946_v55 = vmul.f32 0.1, %v766_v12 }
 0x3a4   : > { %1685 = vmatprep.subr.msk.mxu0 %vm417_vm0, %v2228_v11  ;;  %v947_v57 = vmul.f32 0.1, %v2228_v11 }
 0x3a5   : > { %1686 = vmatpush1.msk.msra.mxu0 %vm417_vm0, %v766_v12 }
 0x3a6   : > { %1687 = vmatmul.mubr.msk.f32.vlgmr.msra.gmra.mrb[6].mxu0 %vm493_vm2, %v2153_v22 }
 0x3a7   : > { %846 = vmatprep.mubr.f32.mxu0 %v1987_v0 }
 0x3aa   : > { %1688 = vmatmul.mubr.msk.f32.gmra.mrb[8].mxu0 %vm493_vm2, %v2165_v23 }
 0x3ab   : > { %852 = vmatprep.mubr.f32.mxu0 %v1987_v0 }
 0x3ae   : > { %1689 = vmatmul.mubr.msk.f32.gmra.mrb[10].mxu0 %vm493_vm2, %v2173_v24 }
 0x3af   : > { %858 = vmatprep.mubr.f32.mxu0 %v1987_v0 }
 0x3b2   : > { %1690 = vmatmul.mubr.msk.f32.gmra.mrb[12].mxu0 %vm493_vm2, %v2181_v25 }
 0x3b3   : > { %1102 = vmatprep.mubr.f32.mxu0 %v1987_v0 }
 0x479   : > { %v842_v13 = vpop.f32.mrb[6].mxu0 }
 0x47a   : > { %v843_v14 = vadd.f32 %v842_v13, %v2186_v26  ;;  %v844_v15 = vpop.f32.mrb[7].mxu0 }
 0x47b   : > { %v845_v18 = vadd.f32 %v844_v15, %v2186_v26 }
 0x47c   : > { %1859 = vtanh.f32 %v843_v14 }
 0x47d   : > { %v848_v19 = vpop.f32.mrb[8].mxu0  ;;  %1861 = vtanh.f32 %v845_v18 }
 0x47e   : > { %v849_v20 = vadd.f32 %v848_v19, %v2189_v30  ;;  %v850_v21 = vpop.f32.mrb[9].mxu0 }
 0x47f   : > { %v851_v27 = vadd.f32 %v850_v21, %v2189_v30 }
 0x480   : > { %1863 = vtanh.f32 %v849_v20 }
 0x481   : > { %1865 = vtanh.f32 %v851_v27  ;;  %v854_v28 = vpop.f32.mrb[10].mxu0 }
 0x482   : > { %v855_v29 = vadd.f32 %v854_v28, %v2194_v36  ;;  %v856_v31 = vpop.f32.mrb[11].mxu0 }
 0x483   : > { %v857_v32 = vadd.f32 %v856_v31, %v2194_v36 }
 0x484   : > { %1867 = vtanh.f32 %v855_v29 }
 0x485   : > { %v860_v33 = vpop.f32.mrb[12].mxu0  ;;  %1869 = vtanh.f32 %v857_v32 }
 0x486   : > { %v861_v34 = vadd.f32 %v860_v33, %v2198_v41  ;;  %v862_v35 = vpop.f32.mrb[13].mxu0  ;;  %v1860_v38 = vpop.eup %1859 }
 0x487   : > { %v863_v37 = vadd.f32 %v862_v35, %v2198_v41  ;;  %v1862_v39 = vpop.eup %1861 }
 0x488   : > { %1871 = vtanh.f32 %v861_v34 }
 0x489   : > { %1873 = vtanh.f32 %v863_v37 }
 0x48a   : > { %v1864_v40 = vpop.eup %1863 }
 0x48b   : > { %v1866_v42 = vpop.eup %1865  ;;  %v1744_v43 = vpack.c.bf16 %v1864_v40, %v1860_v38 }
 0x48c   : > { %v1742_v44 = vpack.c.bf16 %v1866_v42, %v1862_v39 }
 0x48e   : > { %1743 = vmatprep.subr.bf16.mxu1 %v1742_v44  ;;  %1751 = vmatprep.subr.bf16.mxu0 %v1742_v44  ;;  %v1868_v45 = vpop.eup %1867 }
 0x48f   : > { %1745 = vmatpush1.bf16.msra.mxu1 %v1744_v43  ;;  %1753 = vmatpush1.bf16.msra.mxu0 %v1744_v43  ;;  %v1870_v46 = vpop.eup %1869 }
 0x492   : > { %v1872_v47 = vpop.eup %1871 }
 0x493   : > { %v1874_v48 = vpop.eup %1873  ;;  %v1748_v49 = vpack.c.bf16 %v1872_v47, %v1868_v45 }
 0x494   : > { %v1746_v50 = vpack.c.bf16 %v1874_v48, %v1870_v46 }
 0x496   : > { %1747 = vmatprep.subr.bf16.mxu1 %v1746_v50  ;;  %1755 = vmatprep.subr.bf16.mxu0 %v1746_v50 }
 0x497   : > { %1749 = vmatpush1.bf16.msra.mxu1 %v1748_v49  ;;  %1757 = vmatpush1.bf16.msra.mxu0 %v1748_v49 }
 0x49a   : > { %1691 = vmatmul.mubr.msk.f32.vlgmr.msra.gmra.mrb[8].mxu1 %vm609_vm3, %v2205_v58 }
 0x49b   : > { %1025 = vmatprep.mubr.f32.mxu1 %v1987_v0 }
 0x56d   : > { %v939_v51 = vpop.f32.mrb[8].mxu1 }
 0x56e   : > { %v940_v52 = vadd.f32 %v939_v51, %v2210_v59  ;;  %v941_v53 = vpop.f32.mrb[9].mxu1 }
 0x56f   : > { %v942_v54 = vadd.f32 %v941_v53, %v2210_v59 }
 0x570   : > { %v944_v56 = vmul.f32 0.5, %v940_v52 }
 0x571   : > { %v945_v60 = vmul.f32 0.5, %v942_v54 }
 0x572   : > { %v948_v61 = vadd.f32 %v946_v55, %v944_v56 }
 0x573   : > { %v949_v62 = vadd.f32 %v947_v57, %v945_v60 }
 0x575   : > { %v952_v63 = vcombine.low %v948_v61, %v949_v62 }
 0x577   : > { %v2261_v1 = vsub.f32 %v2217_v8, %v952_v63 }
 0x579   : > { %v956_v2 = vcombine.high %v2261_v1, %v2261_v1 }
 0x57b   : > { %1692 = vmatprep.subr.msk.mxu1 %vm417_vm0, %v956_v2 }
 0x57c   : > { %1693 = vmatpush1.msk.msra.mxu1 %vm417_vm0, %v2261_v1 }
 0x57d   : > { %1694 = vmatmul.mubr.msk.f32.vlgmr.msra.gmra.mrb[10].mxu1 %vm413_vm1, %v2116_v6 }
 0x57e   : > { %1199 = vmatprep.mubr.f32.mxu1 %v1987_v0 }
 0x650   : > { %v1027_v3 = vpop.f32.mrb[10].mxu1 }
 0x651   : > { %v1029_v5 = vpop.f32.mrb[11].mxu1  ;;  %v1028_v8 = vadd.f32 %v1027_v3, %v2142_v17 }
 0x652   : > { %v1030_v7 = vadd.f32 %v1029_v5, %v2140_v16 }
 0x653   : > { %v1208_v50 = vmul.f32 0.15, %v1028_v8 }
 0x654   : > { %1695 = vmatprep.subr.msk.mxu0 %vm417_vm0, %v1030_v7  ;;  %v1209_v52 = vmul.f32 0.15, %v1030_v7 }
 0x655   : > { %1696 = vmatpush1.msk.msra.mxu0 %vm417_vm0, %v1028_v8 }
 0x656   : > { %1697 = vmatmul.mubr.msk.f32.vlgmr.msra.gmra.mrb[14].mxu0 %vm493_vm2, %v2153_v22 }
 0x657   : > { %1108 = vmatprep.mubr.f32.mxu0 %v1987_v0 }
 0x65a   : > { %1698 = vmatmul.mubr.msk.f32.gmra.mrb[16].mxu0 %vm493_vm2, %v2165_v23 }
 0x65b   : > { %1114 = vmatprep.mubr.f32.mxu0 %v1987_v0 }
 0x65e   : > { %1699 = vmatmul.mubr.msk.f32.gmra.mrb[18].mxu0 %vm493_vm2, %v2173_v24 }
 0x65f   : > { %1120 = vmatprep.mubr.f32.mxu0 %v1987_v0 }
 0x662   : > { %1700 = vmatmul.mubr.msk.f32.gmra.mrb[20].mxu0 %vm493_vm2, %v2181_v25 }
 0x663   : > { %1461 = vmatprep.mubr.f32.mxu0 %v1987_v0 }
 0x729   : > { %v1104_v9 = vpop.f32.mrb[14].mxu0 }
 0x72a   : > { %v1105_v10 = vadd.f32 %v1104_v9, %v2186_v26  ;;  %v1106_v4 = vpop.f32.mrb[15].mxu0 }
 0x72b   : > { %v1107_v11 = vadd.f32 %v1106_v4, %v2186_v26 }
 0x72c   : > { %1875 = vtanh.f32 %v1105_v10 }
 0x72d   : > { %v1110_v12 = vpop.f32.mrb[16].mxu0  ;;  %1877 = vtanh.f32 %v1107_v11 }
 0x72e   : > { %v1111_v13 = vadd.f32 %v1110_v12, %v2189_v30  ;;  %v1112_v14 = vpop.f32.mrb[17].mxu0 }
 0x72f   : > { %v1113_v15 = vadd.f32 %v1112_v14, %v2189_v30 }
 0x730   : > { %1879 = vtanh.f32 %v1111_v13 }
 0x731   : > { %1881 = vtanh.f32 %v1113_v15  ;;  %v1116_v18 = vpop.f32.mrb[18].mxu0 }
 0x732   : > { %v1117_v19 = vadd.f32 %v1116_v18, %v2194_v36  ;;  %v1118_v20 = vpop.f32.mrb[19].mxu0 }
 0x733   : > { %v1119_v21 = vadd.f32 %v1118_v20, %v2194_v36 }
 0x734   : > { %1883 = vtanh.f32 %v1117_v19 }
 0x735   : > { %v1122_v27 = vpop.f32.mrb[20].mxu0  ;;  %1885 = vtanh.f32 %v1119_v21 }
 0x736   : > { %v1123_v28 = vadd.f32 %v1122_v27, %v2198_v41  ;;  %v1124_v29 = vpop.f32.mrb[21].mxu0  ;;  %v1876_v32 = vpop.eup %1875 }
 0x737   : > { %v1125_v31 = vadd.f32 %v1124_v29, %v2198_v41  ;;  %v1878_v33 = vpop.eup %1877 }
 0x738   : > { %1887 = vtanh.f32 %v1123_v28 }
 0x739   : > { %1889 = vtanh.f32 %v1125_v31 }
 0x73a   : > { %v1880_v34 = vpop.eup %1879 }
 0x73b   : > { %v1882_v35 = vpop.eup %1881  ;;  %v1760_v37 = vpack.c.bf16 %v1880_v34, %v1876_v32 }
 0x73c   : > { %v1758_v38 = vpack.c.bf16 %v1882_v35, %v1878_v33 }
 0x73e   : > { %1759 = vmatprep.subr.bf16.mxu1 %v1758_v38  ;;  %v1884_v39 = vpop.eup %1883 }
 0x73f   : > { %1761 = vmatpush1.bf16.msra.mxu1 %v1760_v37  ;;  %v1886_v40 = vpop.eup %1885 }
 0x742   : > { %v1888_v42 = vpop.eup %1887 }
 0x743   : > { %v1890_v43 = vpop.eup %1889  ;;  %v1764_v44 = vpack.c.bf16 %v1888_v42, %v1884_v39 }
 0x744   : > { %v1762_v45 = vpack.c.bf16 %v1890_v43, %v1886_v40 }
 0x746   : > { %1763 = vmatprep.subr.bf16.mxu1 %v1762_v45 }
 0x747   : > { %1765 = vmatpush1.bf16.msra.mxu1 %v1764_v44 }
 0x74a   : > { %1701 = vmatmul.mubr.msk.f32.vlgmr.msra.gmra.mrb[12].mxu1 %vm609_vm3, %v2205_v58 }
 0x74b   : > { %1287 = vmatprep.mubr.f32.mxu1 %v1987_v0 }
 0x81d   : > { %v1201_v46 = vpop.f32.mrb[12].mxu1 }
 0x81e   : > { %v1202_v47 = vadd.f32 %v1201_v46, %v2210_v59  ;;  %v1203_v48 = vpop.f32.mrb[13].mxu1 }
 0x81f   : > { %v1204_v49 = vadd.f32 %v1203_v48, %v2210_v59 }
 0x820   : > { %v1206_v51 = vmul.f32 0.33333334, %v1202_v47 }
 0x821   : > { %v1207_v53 = vmul.f32 0.33333334, %v1204_v49 }
 0x822   : > { %v1210_v54 = vadd.f32 %v1208_v50, %v1206_v51 }
 0x823   : > { %v1211_v55 = vadd.f32 %v1209_v52, %v1207_v53 }
 0x825   : > { %v1214_v56 = vcombine.low %v1210_v54, %v1211_v55 }
 0x827   : > { %v2301_v57 = vsub.f32 %v2261_v1, %v1214_v56 }
 0x829   : > { %v1218_v60 = vcombine.high %v2301_v57, %v2301_v57 }
 0x82b   : > { %1702 = vmatprep.subr.msk.mxu1 %vm417_vm0, %v1218_v60 }
 0x82c   : > { %1703 = vmatpush1.msk.msra.mxu1 %vm417_vm0, %v2301_v57 }
 0x82d   : > { %1704 = vmatmul.mubr.msk.f32.vlgmr.msra.gmra.mrb[14].mxu1 %vm413_vm1, %v2116_v6  ;;  %1767 = vmatprep.subr.bf16.mxu1 %v1758_v38 }
 0x82e   : > { %1769 = vmatpush1.bf16.msra.mxu1 %v1760_v37  ;;  %1364 = vmatprep.mubr.f32.mxu1 %v1987_v0 }
 0x82f   : > { %1771 = vmatprep.subr.bf16.mxu1 %v1762_v45 }
 0x832   : > { %1773 = vmatpush1.bf16.msra.mxu1 %v1764_v44 }
 0x900   : > { %v1289_v61 = vpop.f32.mrb[14].mxu1 }
 0x901   : > { %v1291_v62 = vpop.f32.mrb[15].mxu1  ;;  %v1290_v1 = vadd.f32 %v1289_v61, %v2142_v17 }
 0x902   : > { %v1292_v63 = vadd.f32 %v1291_v62, %v2140_v16 }
 0x903   : > { %v1470_v32 = vmul.f32 0.2, %v1290_v1 }
 0x904   : > { %1705 = vmatprep.subr.msk.mxu1 %vm417_vm0, %v1292_v63  ;;  %v1471_v34 = vmul.f32 0.2, %v1292_v63 }
 0x905   : > { %1706 = vmatpush1.msk.msra.mxu1 %vm417_vm0, %v1290_v1 }
 0x906   : > { %1707 = vmatmul.mubr.msk.f32.vlgmr.msra.gmra.mrb[16].mxu1 %vm493_vm2, %v2153_v22 }
 0x907   : > { %1370 = vmatprep.mubr.f32.mxu1 %v1987_v0 }
 0x90a   : > { %1708 = vmatmul.mubr.msk.f32.gmra.mrb[18].mxu1 %vm493_vm2, %v2165_v23 }
 0x90b   : > { %1376 = vmatprep.mubr.f32.mxu1 %v1987_v0 }
 0x90e   : > { %1709 = vmatmul.mubr.msk.f32.gmra.mrb[20].mxu1 %vm493_vm2, %v2173_v24 }
 0x90f   : > { %1382 = vmatprep.mubr.f32.mxu1 %v1987_v0 }
 0x912   : > { %1710 = vmatmul.mubr.msk.f32.gmra.mrb[22].mxu1 %vm493_vm2, %v2181_v25 }
 0x9d9   : > { %v1366_v6 = vpop.f32.mrb[16].mxu1 }
 0x9da   : > { %v1367_v16 = vadd.f32 %v1366_v6, %v2186_v26  ;;  %v1368_v17 = vpop.f32.mrb[17].mxu1 }
 0x9db   : > { %v1369_v22 = vadd.f32 %v1368_v17, %v2186_v26 }
 0x9dc   : > { %1891 = vtanh.f32 %v1367_v16 }
 0x9dd   : > { %v1372_v2 = vpop.f32.mrb[18].mxu1  ;;  %1893 = vtanh.f32 %v1369_v22 }
 0x9de   : > { %v1373_v23 = vadd.f32 %v1372_v2, %v2189_v30  ;;  %v1374_v3 = vpop.f32.mrb[19].mxu1 }
 0x9df   : > { %v1375_v5 = vadd.f32 %v1374_v3, %v2189_v30 }
 0x9e0   : > { %1895 = vtanh.f32 %v1373_v23 }
 0x9e1   : > { %1897 = vtanh.f32 %v1375_v5  ;;  %v1378_v24 = vpop.f32.mrb[20].mxu1 }
 0x9e2   : > { %v1379_v7 = vadd.f32 %v1378_v24, %v2194_v36  ;;  %v1380_v25 = vpop.f32.mrb[21].mxu1 }
 0x9e3   : > { %v1381_v8 = vadd.f32 %v1380_v25, %v2194_v36 }
 0x9e4   : > { %1899 = vtanh.f32 %v1379_v7 }
 0x9e5   : > { %v1384_v9 = vpop.f32.mrb[22].mxu1  ;;  %1901 = vtanh.f32 %v1381_v8 }
 0x9e6   : > { %v1385_v26 = vadd.f32 %v1384_v9, %v2198_v41  ;;  %v1386_v10 = vpop.f32.mrb[23].mxu1  ;;  %v1892_v11 = vpop.eup %1891 }
 0x9e7   : > { %v1387_v4 = vadd.f32 %v1386_v10, %v2198_v41  ;;  %v1894_v12 = vpop.eup %1893 }
 0x9e8   : > { %1903 = vtanh.f32 %v1385_v26 }
 0x9e9   : > { %1905 = vtanh.f32 %v1387_v4 }
 0x9ea   : > { %v1896_v30 = vpop.eup %1895 }
 0x9eb   : > { %v1898_v13 = vpop.eup %1897  ;;  %v1776_v14 = vpack.c.bf16 %v1896_v30, %v1892_v11 }
 0x9ec   : > { %v1774_v15 = vpack.c.bf16 %v1898_v13, %v1894_v12 }
 0x9ee   : > { %1775 = vmatprep.subr.bf16.mxu0 %v1774_v15  ;;  %v1900_v18 = vpop.eup %1899 }
 0x9ef   : > { %1777 = vmatpush1.bf16.msra.mxu0 %v1776_v14  ;;  %v1902_v36 = vpop.eup %1901 }
 0x9f2   : > { %v1904_v19 = vpop.eup %1903 }
 0x9f3   : > { %v1906_v20 = vpop.eup %1905  ;;  %v1780_v21 = vpack.c.bf16 %v1904_v19, %v1900_v18 }
 0x9f4   : > { %v1778_v27 = vpack.c.bf16 %v1906_v20, %v1902_v36 }
 0x9f6   : > { %1779 = vmatprep.subr.bf16.mxu0 %v1778_v27 }
 0x9f7   : > { %1781 = vmatpush1.bf16.msra.mxu0 %v1780_v21 }
 0x9fa   : > { %1711 = vmatmul.mubr.msk.f32.vlgmr.msra.gmra.mrb[22].mxu0 %vm609_vm3, %v2205_v58 }
 0x9fb   : > { %1559 = vmatprep.mubr.f32.mxu0 %v1987_v0  ;;  %v1479_v0 = vld [vmem:[%s2405_s7] sm:$0xf] }
 0xacd   : > { %v1463_v41 = vpop.f32.mrb[22].mxu0 }
 0xace   : > { %v1464_v28 = vadd.f32 %v1463_v41, %v2210_v59  ;;  %v1465_v29 = vpop.f32.mrb[23].mxu0 }
 0xacf   : > { %v1466_v31 = vadd.f32 %v1465_v29, %v2210_v59  ;;  %v1484_v59 = vpop.permute.xlu0 %1483 }
 0xad0   : > { %v1468_v33 = vmul.f32 0.25, %v1464_v28 }
 0xad1   : > { %v1469_v35 = vmul.f32 0.25, %v1466_v31 }
 0xad2   : > { %v1472_v37 = vadd.f32 %v1470_v32, %v1468_v33 }
 0xad3   : > { %v1473_v38 = vadd.f32 %v1471_v34, %v1469_v35 }
 0xad5   : > { %v1476_v39 = vcombine.low %v1472_v37, %v1473_v38 }
 0xad7   : > { %v1478_v40 = vsub.f32 %v2301_v57, %v1476_v39 }
 0xad9   : > { %v1487_v58 = vcombine.high %v1478_v40, %v1478_v40 }
 0xadb   : > { %1712 = vmatprep.subr.msk.mxu0 %vm417_vm0, %v1487_v58 }
 0xadc   : > { %1713 = vmatpush1.msk.msra.mxu0 %vm417_vm0, %v1478_v40 }
 0xadd   : > { %1714 = vmatmul.mubr.msk.f32.vlgmr.msra.gmra.mrb[24].mxu0 %vm413_vm1, %v1479_v0 }
 0xbb0   : > { %v1561_v42 = vpop.f32.mrb[24].mxu0 }
 0xbb1   : > { %v1562_v43 = vadd.f32 %v1561_v42, %v1484_v59  ;;  %v1563_v44 = vpop.f32.mrb[25].mxu0 }
 0xbb2   : > { %v1564_v45 = vadd.f32 %v1563_v44, %v1484_v59 }
 0xbb4   : > { %v1568_v46 = vcombine.low %v1562_v43, %v1564_v45 }
 0xbb6   : > { %1570 = vst [vmem:[%s350_s26] sm:$0xff] %v1568_v46 }
 0xbb7   : > { %1920 = shalt.err (!%p1917_p5)
}
 0xbb8   : > { %s1921_s23 = scalar_lea.hbm %s2351_s15, 128  ;;  %s1925_s28 = scalar_lea.hbm %s2407_s9, 256 }
 0xbb9   : > { %p1922_p6 = scmp.ne.s32.totalorder %s2351_s15, %s1921_s23  ;;  %p1926_p10 = scmp.lt.u32.totalorder %s2351_s15, %s2407_s9 }
 0xbba   : > { %p1927_p11 = scmp.lt.u32.totalorder %s1925_s28, %s1921_s23  ;;  %p1929_p13 = scmp.lt.u32.totalorder %s1921_s23, %s2351_s15 }
 0xbbb   : > { %p1923_p7 = pnand %p1922_p6, %p2081_p4 }
 0xbbc   : > { %p1928_p12 = por %p1927_p11, %p1926_p10 }
 0xbbd   : > { %p1924_p9 = pneg %p1923_p7 }
 0xbbe   : > { %p1930_p0 = por %p1929_p13, %p1928_p12 }
 0xbc0   : > { %p1931_p1 = pnand %p1930_p0, %p1924_p9 }
 0xbc2   : > { %1934 = shalt.err (!%p1931_p1)
}
 0xbc3   : > { %1782 = dma.vmem_to_hbm [thread:$0]  (%p2081_p4), %s2353_s27, 128, %s2351_s15, %s1572_s16  }
 0xbc4 PF: > { %p1788_p2 = scmp.ge.s32.totalorder %s1985_s14, 2  ;;  %s1600_s18 = sand.u32 1, %s1965_s30  }
 0xbc5   : > { %s1601_s20 = scalar_lea.sflag [#allocation3], %s1600_s18 }
 0xbc6   : > { %p1785_p3 = pnand %p1788_p2, %p2088_p8 }
 0xbc8   : > { %1960 = dma.done.wait (!%p1785_p3), %s1601_s20, 128  }
 0xbc9   : > { %1962 = vsyncadd (!%p1785_p3), %s1601_s20, 4294967168  ;;  %s22_s14 = sadd.s32 1, %s1985_s14   ;;  %s2410_s30 = smov %s1969_s10 }
 0xbca   : > { %p19_p5 = scmp.ge.s32.totalorder %s22_s14, 4   ;;  %s2411_s10 = smov %s1973_s11 }
 0xbcb   : > { %s2412_s11 = smov %s2094_s22  ;;  %s2413_s12 = smov %s1981_s13 }
 0xbcc   : > { %s2414_s13 = smov %s2416_s17  ;;  %21 = sbr.rel (!%p19_p5) target bundleno = 4 (0x4), region = 91 }
 0xbd3   :  { %1606 = vsyncpa [#allocation3], 1 }
 0xbd4   :  { %1608 = vsyncpa [#allocation3 + $0x1], 1 }

</bundles_post_ra>
